<compile_context>
chip_gen: v6e
topology: v6e:2x2x1
jax: 0.10.0
libtpu: 0.0.40
codegen_flags: <defaults>
</compile_context>

<pallas_src>
import functools

import jax
import jax.numpy as jnp
from jax import lax
from jax.experimental import pallas as pl
from jax.experimental.pallas import tpu as pltpu


# ---------------------------------------------------------------------------
# Kernels
# ---------------------------------------------------------------------------

def _ppnp_fused_kernel(adj_ref, x_ref, o_ref, *, alpha: float, num_layers: int,
                       matmul_dtype):
    """Single-block path: the whole (pre-normalized, (1-alpha)-scaled) adjacency and
    the feature matrix live in VMEM; all propagation layers run in one invocation."""
    adj = adj_ref[...]                                  # [Np, Np] matmul_dtype
    x0 = x_ref[...].astype(jnp.float32)                 # [Np, Cp] f32
    x0a = alpha * x0                                    # hoisted out of the loop

    def body(_, xc):
        return x0a + jnp.dot(adj, xc.astype(matmul_dtype),
                             preferred_element_type=jnp.float32)

    x = lax.fori_loop(0, num_layers, body, x0, unroll=True)
    o_ref[...] = x.astype(o_ref.dtype)


def _ppnp_layer_kernel(adj_ref, x_ref, x0a_ref, o_ref):
    """Row-tiled path (one pallas_call per layer):
       adj_ref : (tm, Np)  matmul_dtype   -- (1-alpha) * D^-1/2 A D^-1/2 row tile
       x_ref   : (Np, Cp)  matmul_dtype   -- previous iterate, resident across grid
       x0a_ref : (tm, Cp)  f32            -- alpha * x0 row tile
       o_ref   : (tm, Cp)  f32
    """
    o_ref[...] = (x0a_ref[...]
                  + jnp.dot(adj_ref[...], x_ref[...],
                            preferred_element_type=jnp.float32)
                  ).astype(o_ref.dtype)


# ---------------------------------------------------------------------------
# Wrapper
# ---------------------------------------------------------------------------

def _round_up(v: int, m: int) -> int:
    return (v + m - 1) // m * m


def _vmem_budget_bytes() -> int:
    """~80% of physical VMEM for the current generation (fallback: 64 MiB)."""
    try:
        cap = int(pltpu.get_tpu_info().vmem_capacity_bytes)
    except Exception:  # pragma: no cover - defensive (interpret mode / old jax)
        cap = 64 * 1024 * 1024
    return int(0.8 * cap)


def _pick_tile_rows(n_pad: int, c_pad: int, adj_bytes: int, budget: int) -> int:
    """Largest tm (multiple of 128, divides n_pad) whose tiled working set fits."""
    best = 128
    for tm in range(128, n_pad + 1, 128):
        if n_pad % tm != 0:
            continue
        est = (2 * tm * n_pad * adj_bytes          # adj row tiles (double-buffered)
               + 2 * n_pad * c_pad * adj_bytes     # resident x (conservative 2x)
               + 2 * tm * c_pad * 4                # x0a tiles
               + 2 * tm * c_pad * 4                # out tiles
               + (2 << 20))                        # slack
        if est <= budget:
            best = tm
    return best


def ppnp2_forward(x, edge_index, *, alpha=0.1, num_layers=1,
                  matmul_dtype=jnp.bfloat16, force_tiled=False, tile_rows=None):
    """PPNP2 forward.  Builds the dense self-looped adjacency + symmetric
    normalization in the wrapper (f32, exact), then runs either a single fused
    Pallas kernel (small graphs) or a row-tiled per-layer kernel (large graphs)."""
    n, c = x.shape
    n_pad = _round_up(max(n, 128), 128)      # MXU / bf16 friendly row count
    c_pad = _round_up(max(c, 128), 128)      # lane-dense feature columns
    adj_bytes = jnp.dtype(matmul_dtype).itemsize

    # --- add_self_loops + to_dense_adj (f32 scatter-add -> exact multi-edge counts)
    loops = jnp.arange(n, dtype=edge_index.dtype)
    src = jnp.concatenate([edge_index[0], loops])
    dst = jnp.concatenate([edge_index[1], loops])
    adj = jnp.zeros((n_pad, n_pad), jnp.float32).at[src, dst].add(1.0)

    # --- symmetric normalization, folded with (1 - alpha), computed ONCE here.
    deg = jnp.sum(adj, axis=1, keepdims=True)                    # [Np, 1]
    dinv = jnp.where(deg > 0.0, lax.rsqrt(jnp.maximum(deg, 1e-30)), 0.0)
    scaled_adj = ((1.0 - alpha) * dinv * adj * dinv.T).astype(matmul_dtype)

    # --- zero-padded features (padded rows/cols provably stay zero: dinv==0 there).
    x_pad = jnp.zeros((n_pad, c_pad), jnp.float32).at[:n, :c].set(
        x.astype(jnp.float32))

    budget = _vmem_budget_bytes()
    est_single = (2 * n_pad * n_pad * adj_bytes
                  + n_pad * c_pad * (4 + 4 + 4 + adj_bytes + 4)
                  + (2 << 20))

    if (not force_tiled) and est_single <= budget:
        # ---------------- single fused kernel, all layers in VMEM ----------------
        kernel = functools.partial(_ppnp_fused_kernel, alpha=float(alpha),
                                   num_layers=int(num_layers),
                                   matmul_dtype=matmul_dtype)
        vmem_limit = int(min(max(est_single, 32 * 1024 * 1024), budget))
        out_pad = pl.pallas_call(
            kernel,
            out_shape=jax.ShapeDtypeStruct((n_pad, c_pad), jnp.float32),
            in_specs=[
                pl.BlockSpec((n_pad, n_pad), lambda: (0, 0)),
                pl.BlockSpec((n_pad, c_pad), lambda: (0, 0)),
            ],
            out_specs=pl.BlockSpec((n_pad, c_pad), lambda: (0, 0)),
            compiler_params=pltpu.CompilerParams(vmem_limit_bytes=vmem_limit),
        )(scaled_adj, x_pad)
    else:
        # -------------- row-tiled, one pallas_call per propagation layer ---------
        tm = int(tile_rows) if tile_rows is not None else _pick_tile_rows(
            n_pad, c_pad, adj_bytes, budget)
        tm = max(128, min(tm, n_pad))
        if n_pad % tm != 0:
            tm = 128
        est_tiled = (2 * tm * n_pad * adj_bytes + 2 * n_pad * c_pad * adj_bytes
                     + 4 * tm * c_pad * 4 + (2 << 20))
        vmem_limit = int(min(max(est_tiled, 32 * 1024 * 1024), budget))

        x0a = alpha * x_pad                                     # [Np, Cp] f32
        x_cur = x_pad
        layer_call = pl.pallas_call(
            _ppnp_layer_kernel,
            out_shape=jax.ShapeDtypeStruct((n_pad, c_pad), jnp.float32),
            grid=(n_pad // tm,),
            in_specs=[
                pl.BlockSpec((tm, n_pad), lambda i: (i, 0)),     # adj row tile
                pl.BlockSpec((n_pad, c_pad), lambda i: (0, 0)),  # resident x
                pl.BlockSpec((tm, c_pad), lambda i: (i, 0)),     # alpha*x0 tile
            ],
            out_specs=pl.BlockSpec((tm, c_pad), lambda i: (i, 0)),
            compiler_params=pltpu.CompilerParams(
                dimension_semantics=("parallel",),
                vmem_limit_bytes=vmem_limit),
        )
        for _ in range(int(num_layers)):
            x_cur = layer_call(scaled_adj, x_cur.astype(matmul_dtype), x0a)
        out_pad = x_cur

    return out_pad[:n, :c].astype(x.dtype)


# ---------------------------------------------------------------------------
# Pure-JAX reference (mirrors the PyTorch forward, all f32)
# ---------------------------------------------------------------------------

def ppnp2_reference(x, edge_index, *, alpha=0.1, num_layers=1):
    n = x.shape[0]
    loops = jnp.arange(n, dtype=edge_index.dtype)
    src = jnp.concatenate([edge_index[0], loops])
    dst = jnp.concatenate([edge_index[1], loops])
    adj = jnp.zeros((n, n), jnp.float32).at[src, dst].add(1.0)
    deg = jnp.diag(jnp.power(adj.sum(axis=1), -0.5))
    norm_adj = deg @ adj @ deg
    x0 = x.astype(jnp.float32)
    out = x0
    for _ in range(num_layers):
        out = alpha * x0 + (1.0 - alpha) * (norm_adj @ out)
    return out


if __name__ == "__main__":
    key = jax.random.PRNGKey(0)
    k_x, k_e, k_w, k_b, k_x2, k_e2 = jax.random.split(key, 6)

    # ------------------------- test 1: fused single-block path ----------------
    N = 16            # nodes
    IN_CHANNELS = 8   # feature dim
    OUT_CHANNELS = 8  # fc output dim (fc is unused in forward, kept for parity)
    ALPHA = 0.1
    NUM_LAYERS = 3

    # Deterministic parameters for the (unused-in-forward) Linear layer.
    fc_weight = jax.random.normal(k_w, (OUT_CHANNELS, IN_CHANNELS), jnp.float32) * 0.1
    fc_bias = jax.random.normal(k_b, (OUT_CHANNELS,), jnp.float32) * 0.1
    del fc_weight, fc_bias  # faithful to reference forward: fc never applied

    x = jax.random.normal(k_x, (N, IN_CHANNELS), jnp.float32)
    num_edges = 32
    flat = jax.random.choice(k_e, N * N, shape=(num_edges,), replace=False)
    edge_index = jnp.stack([flat // N, flat % N]).astype(jnp.int32)  # [2, E]

    ref = ppnp2_reference(x, edge_index, alpha=ALPHA, num_layers=NUM_LAYERS)

    out_f32 = ppnp2_forward(x, edge_index, alpha=ALPHA, num_layers=NUM_LAYERS,
                            matmul_dtype=jnp.float32)
    out_f32 = jax.block_until_ready(out_f32)
    assert out_f32.shape == (N, IN_CHANNELS)
    assert jnp.allclose(out_f32, ref, atol=1e-4, rtol=1e-4), "f32 mismatch vs reference"

    out_bf16 = ppnp2_forward(x, edge_index, alpha=ALPHA, num_layers=NUM_LAYERS)
    out_bf16 = jax.block_until_ready(out_bf16)
    assert out_bf16.shape == (N, IN_CHANNELS)
    assert jnp.allclose(out_bf16, ref, atol=5e-2, rtol=5e-2), "bf16 mismatch vs reference"

    # ------------------------- test 2: row-tiled per-layer path ---------------
    N2, C2, L2, A2 = 300, 8, 2, 0.2
    x2 = jax.random.normal(k_x2, (N2, C2), jnp.float32)
    flat2 = jax.random.choice(k_e2, N2 * N2, shape=(1200,), replace=False)
    edge_index2 = jnp.stack([flat2 // N2, flat2 % N2]).astype(jnp.int32)

    ref2 = ppnp2_reference(x2, edge_index2, alpha=A2, num_layers=L2)
    out_tiled = ppnp2_forward(x2, edge_index2, alpha=A2, num_layers=L2,
                              matmul_dtype=jnp.float32,
                              force_tiled=True, tile_rows=128)
    out_tiled = jax.block_until_ready(out_tiled)
    assert out_tiled.shape == (N2, C2)
    assert jnp.allclose(out_tiled, ref2, atol=1e-3, rtol=1e-3), "tiled mismatch vs reference"

    print("KERNEL_OK")
</pallas_src>

<mosaic_0001>
module attributes {stable_mosaic.version = 11 : i64} {
  func.func @_ppnp_fused_kernel(%arg0: memref<128x128xf32, #tpu.memory_space<vmem>>, %arg1: memref<128x128xf32, #tpu.memory_space<vmem>>, %arg2: memref<128x128xf32, #tpu.memory_space<vmem>>) attributes {dimension_semantics = [], scalar_prefetch = 0 : i64, scratch_operands = 0 : i64, tpu.core_type = #tpu.core_type<tc>} {
    %c0 = arith.constant 0 : index
    %c0_0 = arith.constant 0 : index
    %0 = vector.load %arg0[%c0, %c0_0] : memref<128x128xf32, #tpu.memory_space<vmem>>, vector<128x128xf32>
    %c0_1 = arith.constant 0 : index
    %c0_2 = arith.constant 0 : index
    %1 = vector.load %arg1[%c0_1, %c0_2] : memref<128x128xf32, #tpu.memory_space<vmem>>, vector<128x128xf32>
    %cst = arith.constant 1.000000e-01 : f32
    %2 = vector.broadcast %cst : f32 to vector<128x128xf32>
    %3 = arith.mulf %2, %1 : vector<128x128xf32>
    %c0_i32 = arith.constant 0 : i32
    %cst_3 = arith.constant dense<0.000000e+00> : vector<128x128xf32>
    %4 = tpu.matmul %0, %1, %cst_3 {dimension_numbers = #tpu.dot_dimension_numbers<[1], [0], [0], [1], [0, 0, 1, 1], [], []>} : vector<128x128xf32>, vector<128x128xf32>, vector<128x128xf32> -> vector<128x128xf32>
    %5 = arith.addf %3, %4 : vector<128x128xf32>
    %c1_i32 = arith.constant 1 : i32
    %cst_4 = arith.constant dense<0.000000e+00> : vector<128x128xf32>
    %6 = tpu.matmul %0, %5, %cst_4 {dimension_numbers = #tpu.dot_dimension_numbers<[1], [0], [0], [1], [0, 0, 1, 1], [], []>} : vector<128x128xf32>, vector<128x128xf32>, vector<128x128xf32> -> vector<128x128xf32>
    %7 = arith.addf %3, %6 : vector<128x128xf32>
    %c2_i32 = arith.constant 2 : i32
    %cst_5 = arith.constant dense<0.000000e+00> : vector<128x128xf32>
    %8 = tpu.matmul %0, %7, %cst_5 {dimension_numbers = #tpu.dot_dimension_numbers<[1], [0], [0], [1], [0, 0, 1, 1], [], []>} : vector<128x128xf32>, vector<128x128xf32>, vector<128x128xf32> -> vector<128x128xf32>
    %9 = arith.addf %3, %8 : vector<128x128xf32>
    %c0_6 = arith.constant 0 : index
    %c0_7 = arith.constant 0 : index
    %10 = vector.load %arg2[%c0_6, %c0_7] : memref<128x128xf32, #tpu.memory_space<vmem>>, vector<128x128xf32>
    tpu.vector_store %arg2[%c0_6, %c0_7], %9 {strides = array<i32>} : memref<128x128xf32, #tpu.memory_space<vmem>>, vector<128x128xf32>,
    return
  }
}

</mosaic_0001>

<bundles_post_ra>
// kernel: tpu_custom_call.1
= control target key start
LH: loop header
LB: loop body
LE: loop exit
PB: predicated region body
PF: predicated region fallthrough
CT: control target
= control target key end

     0   :  { %7 = vsyncpa [#allocation3], 0  ;;  %s1274_s0 = inlined_call_operand.hbm [shape: f32[128,128], index: 0, kind: input, shape index: {}]   ;;  %s1275_s1 = inlined_call_operand.hbm [shape: f32[128,128], index: 1, kind: input, shape index: {}]   ;;  %s1276_s2 = inlined_call_operand.hbm [shape: f32[128,128], index: 2, kind: output, shape index: {}]  }
   0x1   :  { %8 = vsyncpa [#allocation6], 0 }
   0x2   :  { %9 = vsyncpa [#allocation4], 0  ;;  %s972_s9 = smov [#allocation2]  }
   0x3   :  { %s15_s10 = sshll.u32 %s972_s9, 4  ;;  %s16_s10 = int_to_ptr.vmem [resolvable:$true] %s15_s10 }
   0x4   :  { %s914_s11 = scalar_lea.vmem %s16_s10, 2048  ;;  %p919_p1 = scmp.lt.s32.totalorder %s16_s10, %s16_s10 }
   0x5   :  { %p915_p0 = scmp.ne.s32.totalorder %s16_s10, %s914_s11  ;;  %p920_p2 = scmp.lt.s32.totalorder %s914_s11, %s914_s11 }
   0x7   :  { %p921_p3 = por %p920_p2, %p919_p1 }
   0x9   :  { %p922_p4 = pnand %p921_p3, %p915_p0 }
   0xb   :  { %925 = shalt.err (!%p922_p4)
}
   0xc   :  { %s973_s12 = smov 128   ;;  %s974_s13 = smov 8  }
   0xd   :  { %21 = dma.hbm_to_vmem [thread:$0]  %s1274_s0, 2048, %s16_s10, [#allocation3], %s973_s12, %s973_s12, %s974_s13  }
   0xe   :  { %s975_s16 = smov [#allocation5]  }
   0xf   :  { %s27_s17 = sshll.u32 %s975_s16, 4  ;;  %s28_s17 = int_to_ptr.vmem [resolvable:$true] %s27_s17 }
  0x10   :  { %s934_s18 = scalar_lea.vmem %s28_s17, 2048  ;;  %p939_p6 = scmp.lt.s32.totalorder %s28_s17, %s28_s17 }
  0x11   :  { %p935_p5 = scmp.ne.s32.totalorder %s28_s17, %s934_s18  ;;  %p940_p7 = scmp.lt.s32.totalorder %s934_s18, %s934_s18 }
  0x13   :  { %p941_p8 = por %p940_p7, %p939_p6 }
  0x15   :  { %p942_p9 = pnand %p941_p8, %p935_p5 }
  0x17   :  { %945 = shalt.err (!%p942_p9)
}
  0x18   :  { %33 = dma.hbm_to_vmem [thread:$0]  %s1275_s1, 2048, %s28_s17, [#allocation6], %s973_s12, %s973_s12, %s974_s13  }
  0x19   :  { %966 = dma.done.wait [#allocation3], 2048  }
  0x1a   :  { %967 = vsyncadd [#allocation3], 4294965248 }
  0x1b   :  { %968 = dma.done.wait [#allocation6], 2048  }
  0x1c   :  { %969 = vsyncadd [#allocation6], 4294965248  ;;  %v1004_v0 = vld [vmem:[#allocation5 + $0x78] sm:$0xff]  ;;  %v1006_v1 = vld [vmem:[#allocation5 + $0x70] sm:$0xff]  ;;  %s976_s0 = smov [#allocation7]  }
  0x1d   :  { %701 = vmatprep.subr.mxu0 %v1004_v0  ;;  %v1010_v2 = vld [vmem:[#allocation5 + $0x68] sm:$0xff]  ;;  %v1014_v3 = vld [vmem:[#allocation5 + $0x60] sm:$0xff]  ;;  %v1018_v4 = vld [vmem:[#allocation5 + $0x58] sm:$0xff]  ;;  %v1127_v45 = vmul.f32 0.1, %v1004_v0  ;;  %s592_s1 = sshll.u32 %s976_s0, 4  ;;  %s593_s1 = int_to_ptr.vmem [resolvable:$true] %s592_s1 }
  0x1e   :  { %702 = vmatpush3.msra.mxu0 %v1004_v0  ;;  %v1022_v5 = vld [vmem:[#allocation5 + $0x50] sm:$0xff]  ;;  %v1026_v6 = vld [vmem:[#allocation5 + $0x48] sm:$0xff]  ;;  %v1028_v7 = vld [vmem:[#allocation2] sm:$0xff]  ;;  %v1130_v47 = vmul.f32 0.1, %v1006_v1  ;;  %s946_s21 = scalar_lea.vmem %s593_s1, 2048  ;;  %p951_p11 = scmp.lt.s32.totalorder %s593_s1, %s593_s1 }
  0x1f   :  { %703 = vmatprep.subr.mxu0 %v1006_v1  ;;  %733 = vmatprep.mubr.f32.mxu0 %v1028_v7  ;;  %v1033_v8 = vld [vmem:[#allocation5 + $0x40] sm:$0xff]  ;;  %v1038_v9 = vld [vmem:[#allocation5 + $0x38] sm:$0xff]  ;;  %v1042_v10 = vld [vmem:[#allocation5 + $0x30] sm:$0xff]  ;;  %v1133_v49 = vmul.f32 0.1, %v1010_v2  ;;  %p947_p10 = scmp.ne.s32.totalorder %s593_s1, %s946_s21  ;;  %p952_p12 = scmp.lt.s32.totalorder %s946_s21, %s946_s21 }
  0x20   :  { %704 = vmatpush3.msra.mxu0 %v1006_v1  ;;  %789 = vmatprep.mubr.f32.mxu1 %v1028_v7  ;;  %v1046_v11 = vld [vmem:[#allocation5 + $0x28] sm:$0xff]  ;;  %v1050_v12 = vld [vmem:[#allocation5 + $0x20] sm:$0xff]  ;;  %v1054_v13 = vld [vmem:[#allocation5 + $0x18] sm:$0xff]  ;;  %v1137_v52 = vmul.f32 0.1, %v1014_v3 }
  0x21   :  { %705 = vmatprep.subr.mxu0 %v1010_v2  ;;  %v1058_v14 = vld [vmem:[#allocation5 + $0x10] sm:$0xff]  ;;  %v1062_v15 = vld [vmem:[#allocation5 + $0x8] sm:$0xff]  ;;  %v1066_v16 = vld [vmem:[#allocation5] sm:$0xff]  ;;  %v1141_v54 = vmul.f32 0.1, %v1018_v4  ;;  %p953_p13 = por %p952_p12, %p951_p11 }
  0x22   :  { %706 = vmatpush3.msra.mxu0 %v1010_v2  ;;  %v1070_v17 = vld [vmem:[#allocation2 + $0x8] sm:$0xff]  ;;  %v1073_v18 = vld [vmem:[#allocation2 + $0x10] sm:$0xff]  ;;  %v1078_v19 = vld [vmem:[#allocation2 + $0x18] sm:$0xff]  ;;  %v1145_v56 = vmul.f32 0.1, %v1022_v5 }
  0x23   :  { %707 = vmatprep.subr.mxu0 %v1014_v3  ;;  %v1080_v20 = vld [vmem:[#allocation2 + $0x20] sm:$0xff]  ;;  %v1084_v21 = vld [vmem:[#allocation2 + $0x28] sm:$0xff]  ;;  %v1086_v22 = vld [vmem:[#allocation2 + $0x30] sm:$0xff]  ;;  %v1149_v58 = vmul.f32 0.1, %v1026_v6  ;;  %p954_p0 = pnand %p953_p13, %p947_p10 }
  0x24   :  { %708 = vmatpush3.msra.mxu0 %v1014_v3  ;;  %v1090_v23 = vld [vmem:[#allocation2 + $0x38] sm:$0xff]  ;;  %v1092_v24 = vld [vmem:[#allocation2 + $0x40] sm:$0xff]  ;;  %v1096_v25 = vld [vmem:[#allocation2 + $0x48] sm:$0xff]  ;;  %v1153_v60 = vmul.f32 0.1, %v1033_v8 }
  0x25   :  { %709 = vmatprep.subr.mxu0 %v1018_v4  ;;  %v1098_v26 = vld [vmem:[#allocation2 + $0x50] sm:$0xff]  ;;  %v1102_v27 = vld [vmem:[#allocation2 + $0x58] sm:$0xff]  ;;  %v1104_v28 = vld [vmem:[#allocation2 + $0x60] sm:$0xff]  ;;  %v1157_v62 = vmul.f32 0.1, %v1038_v9 }
  0x26   :  { %710 = vmatpush3.msra.mxu0 %v1018_v4  ;;  %v1108_v29 = vld [vmem:[#allocation2 + $0x68] sm:$0xff]  ;;  %v1110_v30 = vld [vmem:[#allocation2 + $0x70] sm:$0xff]  ;;  %v1114_v31 = vld [vmem:[#allocation2 + $0x78] sm:$0xff]  ;;  %v1161_v0 = vmul.f32 0.1, %v1042_v10 }
  0x27   :  { %711 = vmatprep.subr.mxu0 %v1022_v5  ;;  %v1165_v2 = vmul.f32 0.1, %v1046_v11  ;;  %v1169_v4 = vmul.f32 0.1, %v1050_v12 }
  0x28   :  { %712 = vmatpush3.msra.mxu0 %v1022_v5 }
  0x29   :  { %713 = vmatprep.subr.mxu0 %v1026_v6 }
  0x2a   :  { %714 = vmatpush3.msra.mxu0 %v1026_v6  ;;  %v1173_v6 = vmul.f32 0.1, %v1054_v13 }
  0x2b   :  { %715 = vmatprep.subr.mxu0 %v1033_v8 }
  0x2c   :  { %716 = vmatpush3.msra.mxu0 %v1033_v8  ;;  %v1177_v8 = vmul.f32 0.1, %v1058_v14 }
  0x2d   :  { %717 = vmatprep.subr.mxu0 %v1038_v9 }
  0x2e   :  { %718 = vmatpush3.msra.mxu0 %v1038_v9 }
  0x2f   :  { %719 = vmatprep.subr.mxu0 %v1042_v10 }
  0x30   :  { %720 = vmatpush3.msra.mxu0 %v1042_v10  ;;  %v1181_v10 = vmul.f32 0.1, %v1062_v15 }
  0x31   :  { %721 = vmatprep.subr.mxu0 %v1046_v11 }
  0x32   :  { %722 = vmatpush3.msra.mxu0 %v1046_v11 }
  0x33   :  { %723 = vmatprep.subr.mxu0 %v1050_v12 }
  0x34   :  { %724 = vmatpush3.msra.mxu0 %v1050_v12  ;;  %v1186_v12 = vmul.f32 0.1, %v1066_v16 }
  0x35   :  { %725 = vmatprep.subr.mxu0 %v1054_v13 }
  0x36   :  { %726 = vmatpush3.msra.mxu0 %v1054_v13 }
  0x37   :  { %727 = vmatprep.subr.mxu0 %v1058_v14 }
  0x38   :  { %728 = vmatpush3.msra.mxu0 %v1058_v14 }
  0x39   :  { %729 = vmatprep.subr.mxu0 %v1062_v15 }
  0x3a   :  { %730 = vmatpush3.msra.mxu0 %v1062_v15 }
  0x3b   :  { %731 = vmatprep.subr.mxu0 %v1066_v16 }
  0x3c   :  { %732 = vmatpush3.msra.mxu0 %v1066_v16 }
  0x3d   :  { %734 = vmatmul.mubr.f32.vlgmr.msra.gmra.mxu0 %v1070_v17 }
  0x3e   :  { %736 = vmatprep.mubr.f32.mxu0 %v1073_v18 }
  0x41   :  { %737 = vmatmul.mubr.f32.gmra.mxu0 %v1078_v19 }
  0x42   :  { %739 = vmatprep.mubr.f32.mxu0 %v1080_v20 }
  0x45   :  { %740 = vmatmul.mubr.f32.gmra.mxu0 %v1084_v21 }
  0x46   :  { %742 = vmatprep.mubr.f32.mxu0 %v1086_v22 }
  0x49   :  { %743 = vmatmul.mubr.f32.gmra.mxu0 %v1090_v23 }
  0x4a   :  { %745 = vmatprep.mubr.f32.mxu0 %v1092_v24 }
  0x4d   :  { %746 = vmatmul.mubr.f32.gmra.mxu0 %v1096_v25 }
  0x4e   :  { %748 = vmatprep.mubr.f32.mxu0 %v1098_v26 }
  0x51   :  { %749 = vmatmul.mubr.f32.gmra.mxu0 %v1102_v27 }
  0x52   :  { %751 = vmatprep.mubr.f32.mxu0 %v1104_v28 }
  0x55   :  { %752 = vmatmul.mubr.f32.gmra.mxu0 %v1108_v29 }
  0x56   :  { %754 = vmatprep.mubr.f32.mxu0 %v1110_v30 }
  0x59   :  { %755 = vmatmul.mubr.f32.gmra.mxu0 %v1114_v31 }
  0x5a   :  { %845 = vmatprep.mubr.f32.mxu0 %v1028_v7 }
  0xfd   :  { %v1118_v32 = vpop.f32.mrf.mxu0 }
  0xfe   :  { %v234_v14 = vadd.f32 %v1118_v32, %v1181_v10 }
  0xff   :  { %v1120_v33 = vpop.f32.mrf.mxu0 }
 0x100   :  { %v233_v15 = vadd.f32 %v1120_v33, %v1186_v12 }
 0x101   :  { %v1122_v34 = vpop.f32.mrf.mxu0 }
 0x102   :  { %v236_v11 = vadd.f32 %v1122_v34, %v1173_v6 }
 0x103   :  { %v1124_v35 = vpop.f32.mrf.mxu0 }
 0x104   :  { %v235_v13 = vadd.f32 %v1124_v35, %v1177_v8 }
 0x105   :  { %v741_v36 = vpop.f32.mrf.mxu0 }
 0x106   :  { %v238_v7 = vadd.f32 %v741_v36, %v1165_v2 }
 0x107   :  { %v174_v37 = vpop.f32.mrf.mxu0 }
 0x108   :  { %v237_v9 = vadd.f32 %v174_v37, %v1169_v4 }
 0x109   :  { %v744_v38 = vpop.f32.mrf.mxu0 }
 0x10a   :  { %v240_v3 = vadd.f32 %v744_v38, %v1157_v62 }
 0x10b   :  { %v184_v39 = vpop.f32.mrf.mxu0 }
 0x10c   :  { %v239_v5 = vadd.f32 %v184_v39, %v1161_v0 }
 0x10d   :  { %v747_v40 = vpop.f32.mrf.mxu0 }
 0x10e   :  { %v242_v63 = vadd.f32 %v747_v40, %v1149_v58 }
 0x10f   :  { %v194_v41 = vpop.f32.mrf.mxu0 }
 0x110   :  { %v241_v1 = vadd.f32 %v194_v41, %v1153_v60 }
 0x111   :  { %v750_v42 = vpop.f32.mrf.mxu0 }
 0x112   :  { %v244_v59 = vadd.f32 %v750_v42, %v1141_v54 }
 0x113   :  { %v204_v43 = vpop.f32.mrf.mxu0 }
 0x114   :  { %v243_v61 = vadd.f32 %v204_v43, %v1145_v56 }
 0x115   :  { %v753_v44 = vpop.f32.mrf.mxu0 }
 0x116   :  { %v246_v55 = vadd.f32 %v753_v44, %v1133_v49 }
 0x117   :  { %v214_v46 = vpop.f32.mrf.mxu0 }
 0x118   :  { %v245_v57 = vadd.f32 %v214_v46, %v1137_v52 }
 0x119   :  { %v756_v48 = vpop.f32.mrf.mxu0 }
 0x11a   :  { %v248_v50 = vadd.f32 %v756_v48, %v1127_v45 }
 0x11b   :  { %v224_v51 = vpop.f32.mrf.mxu0 }
 0x11c   :  { %v247_v53 = vadd.f32 %v224_v51, %v1130_v47  ;;  %757 = vmatprep.subr.mxu1 %v248_v50 }
 0x11d   :  { %758 = vmatpush3.msra.mxu1 %v248_v50 }
 0x11e   :  { %759 = vmatprep.subr.mxu1 %v247_v53 }
 0x11f   :  { %760 = vmatpush3.msra.mxu1 %v247_v53 }
 0x120   :  { %761 = vmatprep.subr.mxu1 %v246_v55 }
 0x121   :  { %762 = vmatpush3.msra.mxu1 %v246_v55 }
 0x122   :  { %763 = vmatprep.subr.mxu1 %v245_v57 }
 0x123   :  { %764 = vmatpush3.msra.mxu1 %v245_v57 }
 0x124   :  { %765 = vmatprep.subr.mxu1 %v244_v59 }
 0x125   :  { %766 = vmatpush3.msra.mxu1 %v244_v59 }
 0x126   :  { %767 = vmatprep.subr.mxu1 %v243_v61 }
 0x127   :  { %768 = vmatpush3.msra.mxu1 %v243_v61 }
 0x128   :  { %769 = vmatprep.subr.mxu1 %v242_v63 }
 0x129   :  { %770 = vmatpush3.msra.mxu1 %v242_v63 }
 0x12a   :  { %771 = vmatprep.subr.mxu1 %v241_v1 }
 0x12b   :  { %772 = vmatpush3.msra.mxu1 %v241_v1 }
 0x12c   :  { %773 = vmatprep.subr.mxu1 %v240_v3 }
 0x12d   :  { %774 = vmatpush3.msra.mxu1 %v240_v3 }
 0x12e   :  { %775 = vmatprep.subr.mxu1 %v239_v5 }
 0x12f   :  { %776 = vmatpush3.msra.mxu1 %v239_v5 }
 0x130   :  { %777 = vmatprep.subr.mxu1 %v238_v7 }
 0x131   :  { %778 = vmatpush3.msra.mxu1 %v238_v7 }
 0x132   :  { %779 = vmatprep.subr.mxu1 %v237_v9 }
 0x133   :  { %780 = vmatpush3.msra.mxu1 %v237_v9 }
 0x134   :  { %781 = vmatprep.subr.mxu1 %v236_v11 }
 0x135   :  { %782 = vmatpush3.msra.mxu1 %v236_v11 }
 0x136   :  { %783 = vmatprep.subr.mxu1 %v235_v13 }
 0x137   :  { %784 = vmatpush3.msra.mxu1 %v235_v13 }
 0x138   :  { %785 = vmatprep.subr.mxu1 %v234_v14 }
 0x139   :  { %786 = vmatpush3.msra.mxu1 %v234_v14 }
 0x13a   :  { %787 = vmatprep.subr.mxu1 %v233_v15 }
 0x13b   :  { %788 = vmatpush3.msra.mxu1 %v233_v15 }
 0x13c   :  { %790 = vmatmul.mubr.f32.vlgmr.msra.gmra.mxu1 %v1070_v17 }
 0x13d   :  { %792 = vmatprep.mubr.f32.mxu1 %v1073_v18 }
 0x140   :  { %793 = vmatmul.mubr.f32.gmra.mxu1 %v1078_v19 }
 0x141   :  { %795 = vmatprep.mubr.f32.mxu1 %v1080_v20 }
 0x144   :  { %796 = vmatmul.mubr.f32.gmra.mxu1 %v1084_v21 }
 0x145   :  { %798 = vmatprep.mubr.f32.mxu1 %v1086_v22 }
 0x148   :  { %799 = vmatmul.mubr.f32.gmra.mxu1 %v1090_v23 }
 0x149   :  { %801 = vmatprep.mubr.f32.mxu1 %v1092_v24 }
 0x14c   :  { %802 = vmatmul.mubr.f32.gmra.mxu1 %v1096_v25 }
 0x14d   :  { %804 = vmatprep.mubr.f32.mxu1 %v1098_v26 }
 0x150   :  { %805 = vmatmul.mubr.f32.gmra.mxu1 %v1102_v27 }
 0x151   :  { %807 = vmatprep.mubr.f32.mxu1 %v1104_v28 }
 0x154   :  { %808 = vmatmul.mubr.f32.gmra.mxu1 %v1108_v29 }
 0x155   :  { %810 = vmatprep.mubr.f32.mxu1 %v1110_v30 }
 0x158   :  { %811 = vmatmul.mubr.f32.gmra.mxu1 %v1114_v31 }
 0x159   :  { %857 = vmatprep.mubr.f32.mxu1 %v1092_v24 }
 0x1fc   :  { %v1210_v16 = vpop.f32.mrf.mxu1 }
 0x1fd   :  { %v395_v11 = vadd.f32 %v1210_v16, %v1181_v10 }
 0x1fe   :  { %v1212_v32 = vpop.f32.mrf.mxu1 }
 0x1ff   :  { %v394_v13 = vadd.f32 %v1212_v32, %v1186_v12 }
 0x200   :  { %v1214_v33 = vpop.f32.mrf.mxu1 }
 0x201   :  { %v397_v7 = vadd.f32 %v1214_v33, %v1173_v6 }
 0x202   :  { %v1216_v34 = vpop.f32.mrf.mxu1 }
 0x203   :  { %v396_v9 = vadd.f32 %v1216_v34, %v1177_v8 }
 0x204   :  { %v797_v35 = vpop.f32.mrf.mxu1 }
 0x205   :  { %v399_v3 = vadd.f32 %v797_v35, %v1165_v2 }
 0x206   :  { %v335_v36 = vpop.f32.mrf.mxu1 }
 0x207   :  { %v398_v5 = vadd.f32 %v335_v36, %v1169_v4 }
 0x208   :  { %v800_v37 = vpop.f32.mrf.mxu1 }
 0x209   :  { %v401_v63 = vadd.f32 %v800_v37, %v1157_v62 }
 0x20a   :  { %v345_v38 = vpop.f32.mrf.mxu1 }
 0x20b   :  { %v400_v1 = vadd.f32 %v345_v38, %v1161_v0 }
 0x20c   :  { %v803_v39 = vpop.f32.mrf.mxu1 }
 0x20d   :  { %v403_v59 = vadd.f32 %v803_v39, %v1149_v58 }
 0x20e   :  { %v355_v40 = vpop.f32.mrf.mxu1 }
 0x20f   :  { %v402_v61 = vadd.f32 %v355_v40, %v1153_v60 }
 0x210   :  { %v806_v41 = vpop.f32.mrf.mxu1 }
 0x211   :  { %v405_v55 = vadd.f32 %v806_v41, %v1141_v54 }
 0x212   :  { %v365_v42 = vpop.f32.mrf.mxu1 }
 0x213   :  { %v404_v57 = vadd.f32 %v365_v42, %v1145_v56 }
 0x214   :  { %v809_v43 = vpop.f32.mrf.mxu1 }
 0x215   :  { %v407_v51 = vadd.f32 %v809_v43, %v1133_v49 }
 0x216   :  { %v375_v44 = vpop.f32.mrf.mxu1 }
 0x217   :  { %v406_v53 = vadd.f32 %v375_v44, %v1137_v52 }
 0x218   :  { %v812_v46 = vpop.f32.mrf.mxu1 }
 0x219   :  { %v409_v24 = vadd.f32 %v812_v46, %v1127_v45 }
 0x21a   :  { %v385_v48 = vpop.f32.mrf.mxu1 }
 0x21b   :  { %v408_v50 = vadd.f32 %v385_v48, %v1130_v47  ;;  %813 = vmatprep.subr.mxu0 %v409_v24  ;;  %869 = vmatprep.subr.mxu1 %v409_v24 }
 0x21c   :  { %814 = vmatpush3.msra.mxu0 %v409_v24  ;;  %885 = vmatpush3.msra.mxu1 %v409_v24 }
 0x21d   :  { %815 = vmatprep.subr.mxu0 %v408_v50  ;;  %870 = vmatprep.subr.mxu1 %v408_v50 }
 0x21e   :  { %816 = vmatpush3.msra.mxu0 %v408_v50  ;;  %886 = vmatpush3.msra.mxu1 %v408_v50 }
 0x21f   :  { %817 = vmatprep.subr.mxu0 %v407_v51  ;;  %871 = vmatprep.subr.mxu1 %v407_v51 }
 0x220   :  { %818 = vmatpush3.msra.mxu0 %v407_v51  ;;  %887 = vmatpush3.msra.mxu1 %v407_v51 }
 0x221   :  { %819 = vmatprep.subr.mxu0 %v406_v53  ;;  %872 = vmatprep.subr.mxu1 %v406_v53 }
 0x222   :  { %820 = vmatpush3.msra.mxu0 %v406_v53  ;;  %888 = vmatpush3.msra.mxu1 %v406_v53 }
 0x223   :  { %821 = vmatprep.subr.mxu0 %v405_v55  ;;  %873 = vmatprep.subr.mxu1 %v405_v55 }
 0x224   :  { %822 = vmatpush3.msra.mxu0 %v405_v55  ;;  %889 = vmatpush3.msra.mxu1 %v405_v55 }
 0x225   :  { %823 = vmatprep.subr.mxu0 %v404_v57  ;;  %874 = vmatprep.subr.mxu1 %v404_v57 }
 0x226   :  { %824 = vmatpush3.msra.mxu0 %v404_v57  ;;  %890 = vmatpush3.msra.mxu1 %v404_v57 }
 0x227   :  { %825 = vmatprep.subr.mxu0 %v403_v59  ;;  %875 = vmatprep.subr.mxu1 %v403_v59 }
 0x228   :  { %826 = vmatpush3.msra.mxu0 %v403_v59  ;;  %891 = vmatpush3.msra.mxu1 %v403_v59 }
 0x229   :  { %827 = vmatprep.subr.mxu0 %v402_v61  ;;  %876 = vmatprep.subr.mxu1 %v402_v61 }
 0x22a   :  { %828 = vmatpush3.msra.mxu0 %v402_v61  ;;  %892 = vmatpush3.msra.mxu1 %v402_v61 }
 0x22b   :  { %829 = vmatprep.subr.mxu0 %v401_v63  ;;  %877 = vmatprep.subr.mxu1 %v401_v63 }
 0x22c   :  { %830 = vmatpush3.msra.mxu0 %v401_v63  ;;  %893 = vmatpush3.msra.mxu1 %v401_v63 }
 0x22d   :  { %831 = vmatprep.subr.mxu0 %v400_v1  ;;  %878 = vmatprep.subr.mxu1 %v400_v1 }
 0x22e   :  { %832 = vmatpush3.msra.mxu0 %v400_v1  ;;  %894 = vmatpush3.msra.mxu1 %v400_v1 }
 0x22f   :  { %833 = vmatprep.subr.mxu0 %v399_v3  ;;  %879 = vmatprep.subr.mxu1 %v399_v3 }
 0x230   :  { %834 = vmatpush3.msra.mxu0 %v399_v3  ;;  %895 = vmatpush3.msra.mxu1 %v399_v3 }
 0x231   :  { %835 = vmatprep.subr.mxu0 %v398_v5  ;;  %880 = vmatprep.subr.mxu1 %v398_v5 }
 0x232   :  { %836 = vmatpush3.msra.mxu0 %v398_v5  ;;  %896 = vmatpush3.msra.mxu1 %v398_v5 }
 0x233   :  { %837 = vmatprep.subr.mxu0 %v397_v7  ;;  %881 = vmatprep.subr.mxu1 %v397_v7 }
 0x234   :  { %838 = vmatpush3.msra.mxu0 %v397_v7  ;;  %897 = vmatpush3.msra.mxu1 %v397_v7 }
 0x235   :  { %839 = vmatprep.subr.mxu0 %v396_v9  ;;  %882 = vmatprep.subr.mxu1 %v396_v9 }
 0x236   :  { %840 = vmatpush3.msra.mxu0 %v396_v9  ;;  %898 = vmatpush3.msra.mxu1 %v396_v9 }
 0x237   :  { %841 = vmatprep.subr.mxu0 %v395_v11  ;;  %883 = vmatprep.subr.mxu1 %v395_v11 }
 0x238   :  { %842 = vmatpush3.msra.mxu0 %v395_v11  ;;  %899 = vmatpush3.msra.mxu1 %v395_v11 }
 0x239   :  { %843 = vmatprep.subr.mxu0 %v394_v13  ;;  %884 = vmatprep.subr.mxu1 %v394_v13 }
 0x23a   :  { %844 = vmatpush3.msra.mxu0 %v394_v13  ;;  %900 = vmatpush3.msra.mxu1 %v394_v13 }
 0x23b   :  { %846 = vmatmul.mubr.f32.vlgmr.msra.gmra.mxu0 %v1070_v17  ;;  %858 = vmatmul.mubr.f32.vlgmr.msra.gmra.mxu1 %v1096_v25 }
 0x23c   :  { %848 = vmatprep.mubr.f32.mxu0 %v1073_v18  ;;  %860 = vmatprep.mubr.f32.mxu1 %v1098_v26 }
 0x23f   :  { %849 = vmatmul.mubr.f32.gmra.mxu0 %v1078_v19  ;;  %861 = vmatmul.mubr.f32.gmra.mxu1 %v1102_v27 }
 0x240   :  { %851 = vmatprep.mubr.f32.mxu0 %v1080_v20  ;;  %863 = vmatprep.mubr.f32.mxu1 %v1104_v28 }
 0x243   :  { %852 = vmatmul.mubr.f32.gmra.mxu0 %v1084_v21  ;;  %864 = vmatmul.mubr.f32.gmra.mxu1 %v1108_v29 }
 0x244   :  { %854 = vmatprep.mubr.f32.mxu0 %v1086_v22  ;;  %866 = vmatprep.mubr.f32.mxu1 %v1110_v30 }
 0x247   :  { %855 = vmatmul.mubr.f32.gmra.mxu0 %v1090_v23  ;;  %867 = vmatmul.mubr.f32.gmra.mxu1 %v1114_v31 }
 0x2fb   :  { %v847_v17 = vpop.f32.mrf.mxu0  ;;  %v859_v18 = vpop.f32.mrf.mxu1 }
 0x2fc   :  { %v556_v19 = vadd.f32 %v847_v17, %v1181_v10  ;;  %v564_v20 = vadd.f32 %v859_v18, %v1149_v58 }
 0x2fd   :  { %v476_v25 = vpop.f32.mrf.mxu0  ;;  %v516_v26 = vpop.f32.mrf.mxu1 }
 0x2fe   :  { %572 = vst [vmem:[#allocation7 + $0x8] sm:$0xff] %v556_v19  ;;  %580 = vst [vmem:[#allocation7 + $0x48] sm:$0xff] %v564_v20  ;;  %v555_v21 = vadd.f32 %v476_v25, %v1186_v12  ;;  %v563_v22 = vadd.f32 %v516_v26, %v1153_v60 }
 0x2ff   :  { %v850_v27 = vpop.f32.mrf.mxu0  ;;  %v862_v28 = vpop.f32.mrf.mxu1 }
 0x300   :  { %571 = vst [vmem:[#allocation7] sm:$0xff] %v555_v21  ;;  %579 = vst [vmem:[#allocation7 + $0x40] sm:$0xff] %v563_v22  ;;  %v558_v23 = vadd.f32 %v850_v27, %v1173_v6  ;;  %v566_v29 = vadd.f32 %v862_v28, %v1141_v54 }
 0x301   :  { %v486_v30 = vpop.f32.mrf.mxu0  ;;  %v526_v31 = vpop.f32.mrf.mxu1 }
 0x302   :  { %574 = vst [vmem:[#allocation7 + $0x18] sm:$0xff] %v558_v23  ;;  %582 = vst [vmem:[#allocation7 + $0x58] sm:$0xff] %v566_v29  ;;  %v557_v58 = vadd.f32 %v486_v30, %v1177_v8  ;;  %v565_v10 = vadd.f32 %v526_v31, %v1145_v56 }
 0x303   :  { %v853_v14 = vpop.f32.mrf.mxu0  ;;  %v865_v12 = vpop.f32.mrf.mxu1 }
 0x304   :  { %573 = vst [vmem:[#allocation7 + $0x10] sm:$0xff] %v557_v58  ;;  %581 = vst [vmem:[#allocation7 + $0x50] sm:$0xff] %v565_v10  ;;  %v560_v60 = vadd.f32 %v853_v14, %v1165_v2  ;;  %v568_v15 = vadd.f32 %v865_v12, %v1133_v49 }
 0x305   :  { %v496_v16 = vpop.f32.mrf.mxu0  ;;  %v536_v6 = vpop.f32.mrf.mxu1 }
 0x306   :  { %576 = vst [vmem:[#allocation7 + $0x28] sm:$0xff] %v560_v60  ;;  %584 = vst [vmem:[#allocation7 + $0x68] sm:$0xff] %v568_v15  ;;  %v559_v54 = vadd.f32 %v496_v16, %v1169_v4  ;;  %v567_v32 = vadd.f32 %v536_v6, %v1137_v52 }
 0x307   :  { %v856_v33 = vpop.f32.mrf.mxu0  ;;  %v868_v8 = vpop.f32.mrf.mxu1 }
 0x308   :  { %575 = vst [vmem:[#allocation7 + $0x20] sm:$0xff] %v559_v54  ;;  %583 = vst [vmem:[#allocation7 + $0x60] sm:$0xff] %v567_v32  ;;  %v562_v56 = vadd.f32 %v856_v33, %v1157_v62  ;;  %v570_v2 = vadd.f32 %v868_v8, %v1127_v45 }
 0x309   :  { %v506_v34 = vpop.f32.mrf.mxu0  ;;  %v546_v49 = vpop.f32.mrf.mxu1 }
 0x30a   :  { %578 = vst [vmem:[#allocation7 + $0x38] sm:$0xff] %v562_v56  ;;  %586 = vst [vmem:[#allocation7 + $0x78] sm:$0xff] %v570_v2  ;;  %v561_v35 = vadd.f32 %v506_v34, %v1161_v0  ;;  %v569_v4 = vadd.f32 %v546_v49, %v1130_v47 }
 0x30c   :  { %577 = vst [vmem:[#allocation7 + $0x30] sm:$0xff] %v561_v35  ;;  %585 = vst [vmem:[#allocation7 + $0x70] sm:$0xff] %v569_v4 }
 0x30d   :  { %957 = shalt.err (!%p954_p0)
}
 0x30e   :  { %598 = dma.vmem_to_hbm [thread:$0]  %s593_s1, 2048, %s1276_s2, [#allocation4], %s973_s12, %s973_s12, %s974_s13  }
 0x30f   :  { %970 = dma.done.wait [#allocation4], 2048  }
 0x310   :  { %971 = vsyncadd [#allocation4], 4294965248 }
 0x311   :  { %602 = vsyncpa [#allocation3], 1 }
 0x312   :  { %603 = vsyncpa [#allocation6], 1 }
 0x313   :  { %604 = vsyncpa [#allocation4], 1 }

</bundles_post_ra>
